<compile_context>
chip_gen: v5e
topology: v5e:2x2
jax: 0.10.0
libtpu: 0.0.40
codegen_flags: <defaults>
</compile_context>

<pallas_src>
import jax
import jax.numpy as jnp
from jax import lax
from jax.experimental import pallas as pl
from jax.experimental.pallas import tpu as pltpu

HIDDEN = 8  # nn.LSTM(state_dim, 8) — hidden size fixed by the module


def _round_up(x, m):
    return ((x + m - 1) // m) * m


def critic_twin_kernel(state_ref, action_ref,
                       w_ih_ref, w_hh_ref, b_lstm_ref,
                       w1s_ref, w1a_ref, b1_ref,
                       w2_ref, b2_ref,
                       wq_col_ref, bq_ref,
                       out_ref,
                       xg_ref, hbuf_ref):
    # Feature-major: state_ref (T, S, BM), action_ref (A, BM), activations (feat, BM).
    T, S, BM = state_ref.shape
    H = w_hh_ref.shape[1]
    mxu_dtype = w1s_ref.dtype            # f32 or bf16 (chosen host-side)

    w_ih = w_ih_ref[...]                               # (4H, S)   mxu dtype
    w_hh = w_hh_ref[...].astype(jnp.float32)           # (4H, H)   f32 (serial path)
    b_l = b_lstm_ref[...]                              # (4H, 1)   f32 (= b_ih + b_hh)

    # --- Hoisted input-hidden projection: T independent MXU passes ------------
    # (no dependence on h; written to VMEM so the recurrence only carries w_hh @ h)
    @pl.loop(0, T)
    def _(t):
        xg_ref[t] = jnp.dot(w_ih, state_ref[t],
                            preferred_element_type=jnp.float32) + b_l   # (4H, BM)

    # --- Serial recurrence: lane-dense (features x batch) carry ---------------
    h0 = jnp.zeros((H, BM), jnp.float32)
    c0 = jnp.zeros((H, BM), jnp.float32)

    def step(t, carry):
        h, c = carry
        # TODO(synk): w_hh could stay staged in the MXU across all T steps.
        gates = xg_ref[t] + jnp.dot(w_hh, h, preferred_element_type=jnp.float32)
        sg = jax.nn.sigmoid(gates)                     # (4H, BM), full-lane EUP
        i_g = sg[0:H, :]
        f_g = sg[H:2 * H, :]
        o_g = sg[3 * H:4 * H, :]
        g_g = jnp.tanh(gates[2 * H:3 * H, :])
        c = f_g * c + i_g * g_g
        h = o_g * jnp.tanh(c)
        # PyTorch flatten order: row block t*H..t*H+H-1 of (T*H, BM) hbuf.
        hbuf_ref[pl.ds(pl.multiple_of(t * H, H), H), :] = h
        return (h, c)

    lax.fori_loop(0, T, step, (h0, c0), unroll=True)

    # --- net_sa[0]: full-depth matmul on the buffered hidden states -----------
    flat_h = hbuf_ref[...].astype(mxu_dtype)                         # (T*H, BM)
    acc = jnp.dot(w1s_ref[...], flat_h, preferred_element_type=jnp.float32)
    acc = acc + jnp.dot(w1a_ref[...], action_ref[...],
                        preferred_element_type=jnp.float32)
    z1 = jnp.maximum(acc + b1_ref[...], 0.0)                         # (mid, BM)

    # --- net_sa[2] -------------------------------------------------------------
    z2 = jnp.dot(w2_ref[...], z1.astype(mxu_dtype),
                 preferred_element_type=jnp.float32) + b2_ref[...]
    z2 = jnp.maximum(z2, 0.0)                                        # (mid, BM)

    # --- net_q1: N=1 projection as VPU multiply + sublane reduction -----------
    q = jnp.sum(z2 * wq_col_ref[...], axis=0, keepdims=True) + bq_ref[...]  # (1, BM)
    out_ref[0] = q.astype(out_ref.dtype)


def critic_twin_forward(state, action, params, *, block_b=1024,
                        mxu_dtype=jnp.float32):
    B, T, S = state.shape
    A = action.shape[1]
    H = HIDDEN
    mid = params["w2"].shape[0]
    assert params["w1s"].shape[1] == T * H, "module only type-checks when T*8 == state slice"

    # --- batch tile ------------------------------------------------------------
    if B < 256:
        BM = B                                   # one full-batch tile
    else:
        # lane-aligned tile; >= 2 grid steps so both v7x TensorCores get work
        BM = min(block_b, _round_up(-(-B // 2), 128))
    grid_b = pl.cdiv(B, BM)
    # No host-side jnp.pad: Pallas masks the ragged last tile; batch columns are
    # independent, so unspecified tail columns never touch valid outputs.

    f32 = jnp.float32
    # Feature-major layout plumbing (cheap host transposes of the activations;
    # weights keep PyTorch's (out, in) layout — no transposes needed).
    state_tm = jnp.transpose(state, (1, 2, 0)).astype(mxu_dtype)     # (T, S, B)
    action_t = jnp.transpose(action).astype(mxu_dtype)               # (A, B)

    w_ih = params["w_ih"].astype(mxu_dtype)                          # (4H, S)
    w_hh = params["w_hh"].astype(f32)                                # (4H, H)
    b_l = params["b_lstm"].reshape(4 * H, 1).astype(f32)             # (4H, 1)
    w1s = params["w1s"].astype(mxu_dtype)                            # (mid, T*H)
    w1a = params["w1a"].astype(mxu_dtype)                            # (mid, A)
    b1 = params["b1"].reshape(mid, 1).astype(f32)                    # (mid, 1)
    w2 = params["w2"].astype(mxu_dtype)                              # (mid, mid)
    b2 = params["b2"].reshape(mid, 1).astype(f32)                    # (mid, 1)
    wq_col = params["wq1"].reshape(mid, 1).astype(f32)               # (mid, 1)
    bq = params["bq1"].astype(f32)                                   # (1, 1)

    inputs = (state_tm, action_t, w_ih, w_hh, b_l,
              w1s, w1a, b1, w2, b2, wq_col, bq)

    def const_spec(arr):
        # Constant across the grid: single-buffered, fetched once, stays resident.
        nd = arr.ndim
        return pl.BlockSpec(tuple(arr.shape), lambda i, _nd=nd: (0,) * _nd,
                            pipeline_mode=pl.Buffered(1))

    in_specs = [
        pl.BlockSpec((T, S, BM), lambda i: (0, 0, i)),               # state tile
        pl.BlockSpec((A, BM), lambda i: (0, i)),                     # action tile
    ] + [const_spec(w) for w in inputs[2:]]

    out_spec = pl.BlockSpec((1, 1, BM), lambda i: (i, 0, 0))         # lane-dense q slab

    # --- VMEM budget: size the tile, then tell the compiler --------------------
    itm = jnp.dtype(mxu_dtype).itemsize
    need = (2 * (T * S * BM + A * BM) * itm              # double-buffered activations
            + 2 * BM * 4                                 # output tile
            + sum(int(w.size) * w.dtype.itemsize for w in inputs[2:])  # weights x1
            + (T * 4 * H * BM + T * H * BM) * 4)         # xg + hbuf scratch
    vmem_limit = int(min(64 << 20, max(32 << 20, int(1.5 * need) + (2 << 20))))

    q = pl.pallas_call(
        critic_twin_kernel,
        out_shape=jax.ShapeDtypeStruct((grid_b, 1, BM), jnp.float32),
        grid_spec=pltpu.PrefetchScalarGridSpec(
            num_scalar_prefetch=0,
            grid=(grid_b,),
            in_specs=in_specs,
            out_specs=out_spec,
            scratch_shapes=[pltpu.VMEM((T, 4 * H, BM), jnp.float32),   # x_gates
                            pltpu.VMEM((T * H, BM), jnp.float32)],     # h history
        ),
        compiler_params=pltpu.CompilerParams(
            dimension_semantics=("parallel",),
            vmem_limit_bytes=vmem_limit),
    )(*inputs)

    return q.reshape(grid_b * BM, 1)[:B]


def init_params(key, state_dim, action_dim, mid_dim, seq_len):
    # Deterministic synthetic initialization (shapes match the PyTorch module).
    # TODO(synk): orthogonal init of layer_norm() is approximated with scaled normals.
    H = HIDDEN
    ks = jax.random.split(key, 10)
    p = {}
    p["w_ih"] = 0.3 * jax.random.normal(ks[0], (4 * H, state_dim), jnp.float32)
    p["w_hh"] = 0.3 * jax.random.normal(ks[1], (4 * H, H), jnp.float32)
    p["b_lstm"] = 0.1 * jax.random.normal(ks[2], (1, 4 * H), jnp.float32)  # b_ih + b_hh

    in1 = state_dim + action_dim  # == seq_len*H + action_dim in the usable configuration
    w1 = (1.0 / jnp.sqrt(in1)) * jax.random.normal(ks[3], (mid_dim, in1), jnp.float32)
    p["w1s"] = w1[:, : seq_len * H]
    p["w1a"] = w1[:, seq_len * H:]
    p["b1"] = 0.1 * jax.random.normal(ks[4], (1, mid_dim), jnp.float32)

    p["w2"] = (1.0 / jnp.sqrt(mid_dim)) * jax.random.normal(ks[5], (mid_dim, mid_dim), jnp.float32)
    p["b2"] = 0.1 * jax.random.normal(ks[6], (1, mid_dim), jnp.float32)

    p["wq1"] = 0.1 * jax.random.normal(ks[7], (1, mid_dim), jnp.float32)  # layer_norm std=0.1
    p["bq1"] = jnp.full((1, 1), 1e-6, jnp.float32)                        # bias_const=1e-6
    return p


def reference_forward(state, action, params):
    # Pure-JAX reference of the same math (for correctness checking).
    B, T, S = state.shape
    H = HIDDEN
    h = jnp.zeros((B, H), jnp.float32)
    c = jnp.zeros((B, H), jnp.float32)
    outs = []
    for t in range(T):
        gates = state[:, t, :] @ params["w_ih"].T + h @ params["w_hh"].T + params["b_lstm"]
        i_g = jax.nn.sigmoid(gates[:, :H])
        f_g = jax.nn.sigmoid(gates[:, H:2 * H])
        g_g = jnp.tanh(gates[:, 2 * H:3 * H])
        o_g = jax.nn.sigmoid(gates[:, 3 * H:])
        c = f_g * c + i_g * g_g
        h = o_g * jnp.tanh(c)
        outs.append(h)
    flat = jnp.concatenate(outs, axis=1)                        # (B, T*H)
    x = jnp.concatenate([flat, action], axis=1)                 # (B, T*H + A)
    w1 = jnp.concatenate([params["w1s"], params["w1a"]], axis=1)
    z1 = jnp.maximum(x @ w1.T + params["b1"], 0.0)
    z2 = jnp.maximum(z1 @ params["w2"].T + params["b2"], 0.0)
    return z2 @ params["wq1"].T + params["bq1"]


if __name__ == "__main__":
    # Small shapes consistent with the module: seq_len * 8 must equal state_dim
    # (the original code only type-checks in that configuration).
    B, T = 2, 2
    state_dim = T * HIDDEN       # 16
    action_dim = 4
    mid_dim = 32

    key = jax.random.PRNGKey(0)
    k_s, k_a, k_p = jax.random.split(key, 3)
    state = jax.random.normal(k_s, (B, T, state_dim), jnp.float32)
    action = jax.random.normal(k_a, (B, action_dim), jnp.float32)
    params = init_params(k_p, state_dim, action_dim, mid_dim, T)

    q1_ref = reference_forward(state, action, params)

    # f32 MXU operands: strict check.
    q1 = jax.block_until_ready(critic_twin_forward(state, action, params))
    assert q1.shape == (B, 1)
    assert jnp.allclose(q1, q1_ref, atol=1e-4, rtol=1e-4), (q1, q1_ref)

    # bf16 MXU operands with f32 accumulation: looser check (bf16 rounding).
    q1_bf16 = jax.block_until_ready(
        critic_twin_forward(state, action, params, mxu_dtype=jnp.bfloat16))
    assert q1_bf16.shape == (B, 1)
    assert jnp.allclose(q1_bf16, q1_ref, atol=5e-2, rtol=5e-2), (q1_bf16, q1_ref)

    print("KERNEL_OK")
</pallas_src>

<mosaic_0001>
module attributes {stable_mosaic.version = 11 : i64} {
  func.func @critic_twin_kernel(%arg0: i32, %arg1: memref<2x16x2xf32, #tpu.memory_space<vmem>>, %arg2: memref<4x2xf32, #tpu.memory_space<vmem>>, %arg3: memref<32x16xf32, #tpu.memory_space<vmem>>, %arg4: memref<32x8xf32, #tpu.memory_space<vmem>>, %arg5: memref<32x1xf32, #tpu.memory_space<vmem>>, %arg6: memref<32x16xf32, #tpu.memory_space<vmem>>, %arg7: memref<32x4xf32, #tpu.memory_space<vmem>>, %arg8: memref<32x1xf32, #tpu.memory_space<vmem>>, %arg9: memref<32x32xf32, #tpu.memory_space<vmem>>, %arg10: memref<32x1xf32, #tpu.memory_space<vmem>>, %arg11: memref<32x1xf32, #tpu.memory_space<vmem>>, %arg12: memref<1x1xf32, #tpu.memory_space<vmem>>, %arg13: memref<1x1x2xf32, #tpu.memory_space<vmem>>, %arg14: memref<2x32x2xf32, #tpu.memory_space<vmem>>, %arg15: memref<16x2xf32, #tpu.memory_space<vmem>>) attributes {dimension_semantics = [#tpu.dimension_semantics<parallel>], iteration_bounds = array<i64: 1>, scalar_prefetch = 0 : i64, scratch_operands = 2 : i64, tpu.core_type = #tpu.core_type<tc>, window_params = [{transform_indices = @transform_0, window_bounds = array<i64: 2, 16, 2>}, {transform_indices = @transform_1, window_bounds = array<i64: 4, 2>}, {pipeline_mode = #tpu.pipeline_mode<synchronous>, transform_indices = @transform_2, window_bounds = array<i64: 32, 16>}, {pipeline_mode = #tpu.pipeline_mode<synchronous>, transform_indices = @transform_3, window_bounds = array<i64: 32, 8>}, {pipeline_mode = #tpu.pipeline_mode<synchronous>, transform_indices = @transform_4, window_bounds = array<i64: 32, 1>}, {pipeline_mode = #tpu.pipeline_mode<synchronous>, transform_indices = @transform_5, window_bounds = array<i64: 32, 16>}, {pipeline_mode = #tpu.pipeline_mode<synchronous>, transform_indices = @transform_6, window_bounds = array<i64: 32, 4>}, {pipeline_mode = #tpu.pipeline_mode<synchronous>, transform_indices = @transform_7, window_bounds = array<i64: 32, 1>}, {pipeline_mode = #tpu.pipeline_mode<synchronous>, transform_indices = @transform_8, window_bounds = array<i64: 32, 32>}, {pipeline_mode = #tpu.pipeline_mode<synchronous>, transform_indices = @transform_9, window_bounds = array<i64: 32, 1>}, {pipeline_mode = #tpu.pipeline_mode<synchronous>, transform_indices = @transform_10, window_bounds = array<i64: 32, 1>}, {pipeline_mode = #tpu.pipeline_mode<synchronous>, transform_indices = @transform_11, window_bounds = array<i64: 1, 1>}, {transform_indices = @transform_12, window_bounds = array<i64: 1, 1, 2>}]} {
    %c0 = arith.constant 0 : index
    %c0_0 = arith.constant 0 : index
    %0 = vector.load %arg3[%c0, %c0_0] : memref<32x16xf32, #tpu.memory_space<vmem>>, vector<32x16xf32>
    %c0_1 = arith.constant 0 : index
    %c0_2 = arith.constant 0 : index
    %1 = vector.load %arg4[%c0_1, %c0_2] : memref<32x8xf32, #tpu.memory_space<vmem>>, vector<32x8xf32>
    %c0_3 = arith.constant 0 : index
    %c0_4 = arith.constant 0 : index
    %2 = vector.load %arg5[%c0_3, %c0_4] : memref<32x1xf32, #tpu.memory_space<vmem>>, vector<32x1xf32>
    %c0_i32 = arith.constant 0 : i32
    %c2_i32 = arith.constant 2 : i32
    %3 = arith.addi %c0_i32, %c2_i32 : i32
    %c1_i32 = arith.constant 1 : i32
    scf.for %arg16 = %c0_i32 to %3 step %c1_i32  : i32 {
      %c1_i32_48 = arith.constant 1 : i32
      %84 = arith.muli %arg16, %c1_i32_48 : i32
      %c0_i32_49 = arith.constant 0 : i32
      %85 = arith.addi %c0_i32_49, %84 : i32
      %86 = arith.index_cast %85 : i32 to index
      %c0_50 = arith.constant 0 : index
      %c0_51 = arith.constant 0 : index
      %87 = vector.load %arg1[%86, %c0_50, %c0_51] : memref<2x16x2xf32, #tpu.memory_space<vmem>>, vector<1x16x2xf32>
      %88 = vector.shape_cast %87 : vector<1x16x2xf32> to vector<16x2xf32>
      %cst_52 = arith.constant dense<0.000000e+00> : vector<32x2xf32>
      %89 = tpu.matmul %0, %88, %cst_52 {dimension_numbers = #tpu.dot_dimension_numbers<[1], [0], [0], [1], [0, 0, 1, 1], [], []>} : vector<32x16xf32>, vector<16x2xf32>, vector<32x2xf32> -> vector<32x2xf32>
      %90 = vector.broadcast %2 : vector<32x1xf32> to vector<32x2xf32>
      %91 = arith.addf %89, %90 : vector<32x2xf32>
      %92 = arith.index_cast %85 : i32 to index
      %c0_53 = arith.constant 0 : index
      %c0_54 = arith.constant 0 : index
      %93 = vector.load %arg14[%92, %c0_53, %c0_54] : memref<2x32x2xf32, #tpu.memory_space<vmem>>, vector<1x32x2xf32>
      %94 = vector.shape_cast %93 : vector<1x32x2xf32> to vector<32x2xf32>
      %95 = vector.shape_cast %91 : vector<32x2xf32> to vector<1x32x2xf32>
      tpu.vector_store %arg14[%92, %c0_53, %c0_54], %95 {strides = array<i32>} : memref<2x32x2xf32, #tpu.memory_space<vmem>>, vector<1x32x2xf32>,
    }
    %c2_i32_5 = arith.constant 2 : i32
    %cst = arith.constant 0.000000e+00 : f32
    %4 = vector.broadcast %cst : f32 to vector<8x2xf32>
    %cst_6 = arith.constant 0.000000e+00 : f32
    %5 = vector.broadcast %cst_6 : f32 to vector<8x2xf32>
    %c0_i32_7 = arith.constant 0 : i32
    %6 = arith.index_cast %c0_i32_7 : i32 to index
    %c0_8 = arith.constant 0 : index
    %c0_9 = arith.constant 0 : index
    %7 = vector.load %arg14[%6, %c0_8, %c0_9] : memref<2x32x2xf32, #tpu.memory_space<vmem>>, vector<1x32x2xf32>
    %8 = vector.shape_cast %7 : vector<1x32x2xf32> to vector<32x2xf32>
    %cst_10 = arith.constant dense<0.000000e+00> : vector<32x2xf32>
    %9 = tpu.matmul %1, %4, %cst_10 {dimension_numbers = #tpu.dot_dimension_numbers<[1], [0], [0], [1], [0, 0, 1, 1], [], []>} : vector<32x8xf32>, vector<8x2xf32>, vector<32x2xf32> -> vector<32x2xf32>
    %10 = arith.addf %8, %9 : vector<32x2xf32>
    %11 = arith.negf %10 : vector<32x2xf32>
    %12 = math.exp %11 : vector<32x2xf32>
    %cst_11 = arith.constant 1.000000e+00 : f32
    %13 = vector.broadcast %cst_11 : f32 to vector<32x2xf32>
    %14 = arith.addf %13, %12 : vector<32x2xf32>
    %15 = arith.divf %13, %14 : vector<32x2xf32>
    %16 = vector.extract_strided_slice %15 {offsets = [0, 0], sizes = [8, 2], strides = [1, 1]} : vector<32x2xf32> to vector<8x2xf32>
    %17 = vector.extract_strided_slice %15 {offsets = [8, 0], sizes = [8, 2], strides = [1, 1]} : vector<32x2xf32> to vector<8x2xf32>
    %18 = vector.extract_strided_slice %15 {offsets = [24, 0], sizes = [8, 2], strides = [1, 1]} : vector<32x2xf32> to vector<8x2xf32>
    %19 = vector.extract_strided_slice %10 {offsets = [16, 0], sizes = [8, 2], strides = [1, 1]} : vector<32x2xf32> to vector<8x2xf32>
    %20 = math.tanh %19 : vector<8x2xf32>
    %21 = arith.mulf %17, %5 : vector<8x2xf32>
    %22 = arith.mulf %16, %20 : vector<8x2xf32>
    %23 = arith.addf %21, %22 : vector<8x2xf32>
    %24 = math.tanh %23 : vector<8x2xf32>
    %25 = arith.mulf %18, %24 : vector<8x2xf32>
    %c8_i32 = arith.constant 8 : i32
    %26 = arith.muli %c0_i32_7, %c8_i32 : i32
    %27 = tpu.assume_multiple %26, 8 : i32
    %28 = arith.index_cast %27 : i32 to index
    %c0_12 = arith.constant 0 : index
    %29 = vector.load %arg15[%28, %c0_12] : memref<16x2xf32, #tpu.memory_space<vmem>>, vector<8x2xf32>
    tpu.vector_store %arg15[%28, %c0_12], %25 {strides = array<i32>} : memref<16x2xf32, #tpu.memory_space<vmem>>, vector<8x2xf32>,
    %c1_i32_13 = arith.constant 1 : i32
    %30 = arith.index_cast %c1_i32_13 : i32 to index
    %c0_14 = arith.constant 0 : index
    %c0_15 = arith.constant 0 : index
    %31 = vector.load %arg14[%30, %c0_14, %c0_15] : memref<2x32x2xf32, #tpu.memory_space<vmem>>, vector<1x32x2xf32>
    %32 = vector.shape_cast %31 : vector<1x32x2xf32> to vector<32x2xf32>
    %cst_16 = arith.constant dense<0.000000e+00> : vector<32x2xf32>
    %33 = tpu.matmul %1, %25, %cst_16 {dimension_numbers = #tpu.dot_dimension_numbers<[1], [0], [0], [1], [0, 0, 1, 1], [], []>} : vector<32x8xf32>, vector<8x2xf32>, vector<32x2xf32> -> vector<32x2xf32>
    %34 = arith.addf %32, %33 : vector<32x2xf32>
    %35 = arith.negf %34 : vector<32x2xf32>
    %36 = math.exp %35 : vector<32x2xf32>
    %cst_17 = arith.constant 1.000000e+00 : f32
    %37 = vector.broadcast %cst_17 : f32 to vector<32x2xf32>
    %38 = arith.addf %37, %36 : vector<32x2xf32>
    %39 = arith.divf %37, %38 : vector<32x2xf32>
    %40 = vector.extract_strided_slice %39 {offsets = [0, 0], sizes = [8, 2], strides = [1, 1]} : vector<32x2xf32> to vector<8x2xf32>
    %41 = vector.extract_strided_slice %39 {offsets = [8, 0], sizes = [8, 2], strides = [1, 1]} : vector<32x2xf32> to vector<8x2xf32>
    %42 = vector.extract_strided_slice %39 {offsets = [24, 0], sizes = [8, 2], strides = [1, 1]} : vector<32x2xf32> to vector<8x2xf32>
    %43 = vector.extract_strided_slice %34 {offsets = [16, 0], sizes = [8, 2], strides = [1, 1]} : vector<32x2xf32> to vector<8x2xf32>
    %44 = math.tanh %43 : vector<8x2xf32>
    %45 = arith.mulf %41, %23 : vector<8x2xf32>
    %46 = arith.mulf %40, %44 : vector<8x2xf32>
    %47 = arith.addf %45, %46 : vector<8x2xf32>
    %48 = math.tanh %47 : vector<8x2xf32>
    %49 = arith.mulf %42, %48 : vector<8x2xf32>
    %c8_i32_18 = arith.constant 8 : i32
    %50 = arith.muli %c1_i32_13, %c8_i32_18 : i32
    %51 = tpu.assume_multiple %50, 8 : i32
    %52 = arith.index_cast %51 : i32 to index
    %c0_19 = arith.constant 0 : index
    %53 = vector.load %arg15[%52, %c0_19] : memref<16x2xf32, #tpu.memory_space<vmem>>, vector<8x2xf32>
    tpu.vector_store %arg15[%52, %c0_19], %49 {strides = array<i32>} : memref<16x2xf32, #tpu.memory_space<vmem>>, vector<8x2xf32>,
    %c2_i32_20 = arith.constant 2 : i32
    %c0_21 = arith.constant 0 : index
    %c0_22 = arith.constant 0 : index
    %54 = vector.load %arg15[%c0_21, %c0_22] : memref<16x2xf32, #tpu.memory_space<vmem>>, vector<16x2xf32>
    %c0_23 = arith.constant 0 : index
    %c0_24 = arith.constant 0 : index
    %55 = vector.load %arg6[%c0_23, %c0_24] : memref<32x16xf32, #tpu.memory_space<vmem>>, vector<32x16xf32>
    %cst_25 = arith.constant dense<0.000000e+00> : vector<32x2xf32>
    %56 = tpu.matmul %55, %54, %cst_25 {dimension_numbers = #tpu.dot_dimension_numbers<[1], [0], [0], [1], [0, 0, 1, 1], [], []>} : vector<32x16xf32>, vector<16x2xf32>, vector<32x2xf32> -> vector<32x2xf32>
    %c0_26 = arith.constant 0 : index
    %c0_27 = arith.constant 0 : index
    %57 = vector.load %arg7[%c0_26, %c0_27] : memref<32x4xf32, #tpu.memory_space<vmem>>, vector<32x4xf32>
    %c0_28 = arith.constant 0 : index
    %c0_29 = arith.constant 0 : index
    %58 = vector.load %arg2[%c0_28, %c0_29] : memref<4x2xf32, #tpu.memory_space<vmem>>, vector<4x2xf32>
    %cst_30 = arith.constant dense<0.000000e+00> : vector<32x2xf32>
    %59 = tpu.matmul %57, %58, %cst_30 {dimension_numbers = #tpu.dot_dimension_numbers<[1], [0], [0], [1], [0, 0, 1, 1], [], []>} : vector<32x4xf32>, vector<4x2xf32>, vector<32x2xf32> -> vector<32x2xf32>
    %60 = arith.addf %56, %59 : vector<32x2xf32>
    %c0_31 = arith.constant 0 : index
    %c0_32 = arith.constant 0 : index
    %61 = vector.load %arg8[%c0_31, %c0_32] : memref<32x1xf32, #tpu.memory_space<vmem>>, vector<32x1xf32>
    %62 = vector.broadcast %61 : vector<32x1xf32> to vector<32x2xf32>
    %63 = arith.addf %60, %62 : vector<32x2xf32>
    %cst_33 = arith.constant 0.000000e+00 : f32
    %64 = vector.broadcast %cst_33 : f32 to vector<32x2xf32>
    %65 = arith.maximumf %63, %64 : vector<32x2xf32>
    %c0_34 = arith.constant 0 : index
    %c0_35 = arith.constant 0 : index
    %66 = vector.load %arg9[%c0_34, %c0_35] : memref<32x32xf32, #tpu.memory_space<vmem>>, vector<32x32xf32>
    %cst_36 = arith.constant dense<0.000000e+00> : vector<32x2xf32>
    %67 = tpu.matmul %66, %65, %cst_36 {dimension_numbers = #tpu.dot_dimension_numbers<[1], [0], [0], [1], [0, 0, 1, 1], [], []>} : vector<32x32xf32>, vector<32x2xf32>, vector<32x2xf32> -> vector<32x2xf32>
    %c0_37 = arith.constant 0 : index
    %c0_38 = arith.constant 0 : index
    %68 = vector.load %arg10[%c0_37, %c0_38] : memref<32x1xf32, #tpu.memory_space<vmem>>, vector<32x1xf32>
    %69 = vector.broadcast %68 : vector<32x1xf32> to vector<32x2xf32>
    %70 = arith.addf %67, %69 : vector<32x2xf32>
    %cst_39 = arith.constant 0.000000e+00 : f32
    %71 = vector.broadcast %cst_39 : f32 to vector<32x2xf32>
    %72 = arith.maximumf %70, %71 : vector<32x2xf32>
    %c0_40 = arith.constant 0 : index
    %c0_41 = arith.constant 0 : index
    %73 = vector.load %arg11[%c0_40, %c0_41] : memref<32x1xf32, #tpu.memory_space<vmem>>, vector<32x1xf32>
    %74 = vector.broadcast %73 : vector<32x1xf32> to vector<32x2xf32>
    %75 = arith.mulf %72, %74 : vector<32x2xf32>
    %cst_42 = arith.constant dense<0.000000e+00> : vector<2xf32>
    %76 = vector.multi_reduction <add>, %75, %cst_42 [0] : vector<32x2xf32> to vector<2xf32>
    %77 = vector.shape_cast %76 : vector<2xf32> to vector<1x2xf32>
    %c0_43 = arith.constant 0 : index
    %c0_44 = arith.constant 0 : index
    %78 = vector.load %arg12[%c0_43, %c0_44] : memref<1x1xf32, #tpu.memory_space<vmem>>, vector<1x1xf32>
    %79 = vector.broadcast %78 : vector<1x1xf32> to vector<1x2xf32>
    %80 = arith.addf %77, %79 : vector<1x2xf32>
    %c0_45 = arith.constant 0 : index
    %c0_46 = arith.constant 0 : index
    %c0_47 = arith.constant 0 : index
    %81 = vector.load %arg13[%c0_45, %c0_46, %c0_47] : memref<1x1x2xf32, #tpu.memory_space<vmem>>, vector<1x1x2xf32>
    %82 = vector.shape_cast %81 : vector<1x1x2xf32> to vector<1x2xf32>
    %83 = vector.shape_cast %80 : vector<1x2xf32> to vector<1x1x2xf32>
    tpu.vector_store %arg13[%c0_45, %c0_46, %c0_47], %83 {strides = array<i32>} : memref<1x1x2xf32, #tpu.memory_space<vmem>>, vector<1x1x2xf32>,
    return
  }
  func.func @transform_0(%arg0: i32) -> (i32, i32, i32) {
    %c0_i32 = arith.constant 0 : i32
    %c0_i32_0 = arith.constant 0 : i32
    %c0_i32_1 = arith.constant 0 : i32
    return %c0_i32, %c0_i32_0, %arg0 : i32, i32, i32
  }
  func.func @transform_1(%arg0: i32) -> (i32, i32) {
    %c0_i32 = arith.constant 0 : i32
    %c0_i32_0 = arith.constant 0 : i32
    return %c0_i32, %arg0 : i32, i32
  }
  func.func @transform_2(%arg0: i32) -> (i32, i32) {
    %c0_i32 = arith.constant 0 : i32
    %c0_i32_0 = arith.constant 0 : i32
    %c0_i32_1 = arith.constant 0 : i32
    return %c0_i32, %c0_i32_0 : i32, i32
  }
  func.func @transform_3(%arg0: i32) -> (i32, i32) {
    %c0_i32 = arith.constant 0 : i32
    %c0_i32_0 = arith.constant 0 : i32
    %c0_i32_1 = arith.constant 0 : i32
    return %c0_i32, %c0_i32_0 : i32, i32
  }
  func.func @transform_4(%arg0: i32) -> (i32, i32) {
    %c0_i32 = arith.constant 0 : i32
    %c0_i32_0 = arith.constant 0 : i32
    %c0_i32_1 = arith.constant 0 : i32
    return %c0_i32, %c0_i32_0 : i32, i32
  }
  func.func @transform_5(%arg0: i32) -> (i32, i32) {
    %c0_i32 = arith.constant 0 : i32
    %c0_i32_0 = arith.constant 0 : i32
    %c0_i32_1 = arith.constant 0 : i32
    return %c0_i32, %c0_i32_0 : i32, i32
  }
  func.func @transform_6(%arg0: i32) -> (i32, i32) {
    %c0_i32 = arith.constant 0 : i32
    %c0_i32_0 = arith.constant 0 : i32
    %c0_i32_1 = arith.constant 0 : i32
    return %c0_i32, %c0_i32_0 : i32, i32
  }
  func.func @transform_7(%arg0: i32) -> (i32, i32) {
    %c0_i32 = arith.constant 0 : i32
    %c0_i32_0 = arith.constant 0 : i32
    %c0_i32_1 = arith.constant 0 : i32
    return %c0_i32, %c0_i32_0 : i32, i32
  }
  func.func @transform_8(%arg0: i32) -> (i32, i32) {
    %c0_i32 = arith.constant 0 : i32
    %c0_i32_0 = arith.constant 0 : i32
    %c0_i32_1 = arith.constant 0 : i32
    return %c0_i32, %c0_i32_0 : i32, i32
  }
  func.func @transform_9(%arg0: i32) -> (i32, i32) {
    %c0_i32 = arith.constant 0 : i32
    %c0_i32_0 = arith.constant 0 : i32
    %c0_i32_1 = arith.constant 0 : i32
    return %c0_i32, %c0_i32_0 : i32, i32
  }
  func.func @transform_10(%arg0: i32) -> (i32, i32) {
    %c0_i32 = arith.constant 0 : i32
    %c0_i32_0 = arith.constant 0 : i32
    %c0_i32_1 = arith.constant 0 : i32
    return %c0_i32, %c0_i32_0 : i32, i32
  }
  func.func @transform_11(%arg0: i32) -> (i32, i32) {
    %c0_i32 = arith.constant 0 : i32
    %c0_i32_0 = arith.constant 0 : i32
    %c0_i32_1 = arith.constant 0 : i32
    return %c0_i32, %c0_i32_0 : i32, i32
  }
  func.func @transform_12(%arg0: i32) -> (i32, i32, i32) {
    %c0_i32 = arith.constant 0 : i32
    %c0_i32_0 = arith.constant 0 : i32
    %c0_i32_1 = arith.constant 0 : i32
    return %arg0, %c0_i32, %c0_i32_0 : i32, i32, i32
  }
}

</mosaic_0001>

<bundles_post_ra>
// kernel: tpu_custom_call.1
= control target key start
LH: loop header
LB: loop body
LE: loop exit
PB: predicated region body
PF: predicated region fallthrough
CT: control target
= control target key end

     0   :  { %s1014_s0 = inlined_call_operand.vmem [shape: f32[2,16,2], index: 0, kind: input, shape index: {}]   ;;  %s1015_s1 = inlined_call_operand.vmem [shape: f32[4,2], index: 1, kind: input, shape index: {}]   ;;  %s1016_s2 = inlined_call_operand.vmem [shape: f32[32,16], index: 2, kind: input, shape index: {}]   ;;  %s1017_s3 = inlined_call_operand.vmem [shape: f32[32,8], index: 3, kind: input, shape index: {}]   ;;  %s1018_s4 = inlined_call_operand.vmem [shape: f32[32,1], index: 4, kind: input, shape index: {}]   ;;  %s1019_s5 = inlined_call_operand.vmem [shape: f32[32,16], index: 5, kind: input, shape index: {}]   ;;  %s1020_s6 = inlined_call_operand.vmem [shape: f32[32,4], index: 6, kind: input, shape index: {}]   ;;  %s1021_s7 = inlined_call_operand.vmem [shape: f32[32,1], index: 7, kind: input, shape index: {}]   ;;  %s1022_s8 = inlined_call_operand.vmem [shape: f32[32,32], index: 8, kind: input, shape index: {}]   ;;  %s1023_s9 = inlined_call_operand.vmem [shape: f32[32,1], index: 9, kind: input, shape index: {}]   ;;  %s1024_s10 = inlined_call_operand.vmem [shape: f32[32,1], index: 10, kind: input, shape index: {}]   ;;  %s1025_s11 = inlined_call_operand.<no memory space> [shape: f32[1,1], index: 11, kind: input, shape index: {}]   ;;  %s1026_s12 = inlined_call_operand.hbm [shape: f32[1,1,2], index: 12, kind: output, shape index: {}]  }
   0x1   :  { %v17_v0 = vstv %s1025_s11 }
   0x2   :  { %18 = vst [vmem:[#allocation4] sm:$0x1] %v17_v0 }
   0x3   :  { %19 = vsyncpa [#allocation6], 0  ;;  %v44_v1 = vld [vmem:[%s1016_s2] sm:$0xff]  ;;  %v45_v2 = vld [vmem:[%s1016_s2 + $0x8] sm:$0xff]  ;;  %s875_s27 = smov 0  }
   0x4   :  { %v46_v3 = vld [vmem:[%s1016_s2 + $0x10] sm:$0xff]  ;;  %v47_v4 = vld [vmem:[%s1016_s2 + $0x18] sm:$0xff]  ;;  %v846_v5 = vld [vmem:[%s1017_s3] sm:$0xff] }
   0x5   :  { %v851_v6 = vld [vmem:[%s1017_s3 + $0x8] sm:$0xff]  ;;  %v856_v7 = vld [vmem:[%s1017_s3 + $0x10] sm:$0xff]  ;;  %v861_v8 = vld [vmem:[%s1017_s3 + $0x18] sm:$0xff] }
   0x6   :  { %v52_v9 = vld [vmem:[%s1018_s4] sm:$0xff]  ;;  %v53_v10 = vld [vmem:[%s1018_s4 + $0x8] sm:$0xff]  ;;  %v54_v11 = vld [vmem:[%s1018_s4 + $0x10] sm:$0xff] }
   0x7   :  { %v55_v12 = vld [vmem:[%s1018_s4 + $0x18] sm:$0xff] }
   0x8 LB: > { %v759_v13 = vmov 0   ;;  %s634_s3 = sshll.u32 %s757_s27, 4  ;;  %vm86_vm0 = vcmask 130048   ;;  %s639_s4 = sshll.u32 %s757_s27, 5  ;;  %vm130_vm1 = vcmask 15360   ;;  %s757_s27 = sphi %s875_s27, %s61_s27  }
   0x9   : > { %689 = vset.pattern.permute.xlu1 %v759_v13  ;;  %688 = vset.pattern.permute.xlu0 %v759_v13  ;;  %s63_s30 = scalar_lea.vmem %s1014_s0, %s634_s3  ;;  %s129_s13 = scalar_lea.vmem [#allocation2], %s639_s4 }
   0xa   : > { %78 = vperm.xlu1 %689, %v54_v11   ;;  %68 = vperm.xlu0 %688, %v52_v9   ;;  %v65_v14 = vld [vmem:[%s63_s30 + $0x8] sm:$0xff]  ;;  %v64_v15 = vld [vmem:[%s63_s30] sm:$0xff]  ;;  %s61_s27 = sadd.s32 1, %s757_s27  }
   0xb   : > { %113 = vmatpush.msra.mxu0 %v65_v14  ;;  %667 = vmatpush.msra.mxu1 %v65_v14  ;;  %p58_p0 = scmp.ge.s32.totalorder %s61_s27, 2  }
   0xc   : > { %668 = vmatpush.msra.mxu2 %v65_v14  ;;  %669 = vmatpush.msra.mxu3 %v65_v14  ;;  %vm139_vm2 = vcmask (%p58_p0), 64512   ;;  %v760_v28 = vmov (%p58_p0), 0.0  }
   0xd   : > { %114 = vmatpush.msra.mxu0 %v64_v15  ;;  %670 = vmatpush.msra.mxu1 %v64_v15 }
   0xe   : > { %671 = vmatpush.msra.mxu2 %v64_v15  ;;  %672 = vmatpush.msra.mxu3 %v64_v15 }
   0xf   : > { %635 = vmatmul.msk.f32.vlgmr.msra.gmra.mxu0 %vm86_vm0, %v44_v1  ;;  %636 = vmatmul.msk.f32.vlgmr.msra.gmra.mxu1 %vm86_vm0, %v45_v2 }
  0x10   : > { %637 = vmatmul.msk.f32.vlgmr.msra.gmra.mxu2 %vm86_vm0, %v46_v3  ;;  %638 = vmatmul.msk.f32.vlgmr.msra.gmra.mxu3 %vm86_vm0, %v47_v4 }
  0x11   :  { %167 = vmatpush.msra.mxu0 (%p58_p0), %v760_v28  ;;  %673 = vmatpush.msra.mxu1 (%p58_p0), %v760_v28 }
  0x12   : > { %83 = vperm.xlu1 %689, %v55_v12   ;;  %73 = vperm.xlu0 %688, %v53_v10  }
  0x13   :  { %675 = vmatpush.msra.mxu3 (%p58_p0), %v760_v28  ;;  %674 = vmatpush.msra.mxu2 (%p58_p0), %v760_v28 }
  0x17   :  { %640 = vmatmul.msk.f32.vlgmr.msra.gmra.mxu0 (%p58_p0), %vm139_vm2, %v846_v5  ;;  %641 = vmatmul.msk.f32.vlgmr.msra.gmra.mxu1 (%p58_p0), %vm139_vm2, %v851_v6 }
  0x18   :  { %643 = vmatmul.msk.f32.vlgmr.msra.gmra.mxu3 (%p58_p0), %vm139_vm2, %v861_v8  ;;  %642 = vmatmul.msk.f32.vlgmr.msra.gmra.mxu2 (%p58_p0), %vm139_vm2, %v856_v7 }
  0x7c   : > { %v69_v16 = vpop.permute.xlu0 %68  ;;  %v79_v17 = vpop.permute.xlu1 %78 }
  0x84   : > { %v74_v18 = vpop.permute.xlu0 %73  ;;  %v84_v23 = vpop.permute.xlu1 %83 }
  0x8c   : > { %v116_v19 = vpop.f32.mrf.mxu0  ;;  %v119_v20 = vpop.f32.mrf.mxu1 }
  0x8d   : > { %v117_v21 = vadd.f32 %v116_v19, %v69_v16  ;;  %v120_v22 = vadd.f32 %v119_v20, %v74_v18 }
  0x8f   : > { %131 = vst.msk [vmem:[%s129_s13] sm:$0xff] %vm130_vm1, %v117_v21 }
  0x90   : > { %132 = vst.msk [vmem:[%s129_s13 + $0x8] sm:$0xff] %vm130_vm1, %v120_v22 }
  0x93   : > { %v122_v24 = vpop.f32.mrf.mxu2  ;;  %v125_v25 = vpop.f32.mrf.mxu3  ;;  %60 = sbr.rel (!%p58_p0) target bundleno = 8 (0x8), region = 79 }
  0x94   : > { %v123_v26 = vadd.f32 %v122_v24, %v79_v17  ;;  %v126_v27 = vadd.f32 %v125_v25, %v84_v23  ;;  %v169_v31 = vpop.f32.mrf.mxu0 (%p58_p0)  ;;  %v172_v33 = vpop.f32.mrf.mxu1 (%p58_p0) }
  0x96   : > { %133 = vst.msk [vmem:[%s129_s13 + $0x10] sm:$0xff] %vm130_vm1, %v123_v26 }
  0x97   : > { %134 = vst.msk [vmem:[%s129_s13 + $0x18] sm:$0xff] %vm130_vm1, %v126_v27  ;;  %s616_s13 = sshll.u32 (%p58_p0), %s1026_s12, 4  ;;  %s617_s13 = int_to_ptr.hbm [resolvable:$true] %s616_s13 }
  0x9b   :  { %v178_v38 = vpop.f32.mrf.mxu3  ;;  %v175_v46 = vpop.f32.mrf.mxu2 }
  0x9e   :  { %v135_v29 = vld [vmem:[#allocation2] sm:$0xff]  ;;  %v136_v30 = vld [vmem:[#allocation2 + $0x8] sm:$0xff]  ;;  %v138_v37 = vld [vmem:[#allocation2 + $0x18] sm:$0xff] }
  0x9f   :  { %v181_v32 = vadd.f32 %v169_v31, %v135_v29  ;;  %v182_v34 = vadd.f32 %v172_v33, %v136_v30  ;;  %v184_v39 = vadd.f32 %v178_v38, %v138_v37  ;;  %v137_v45 = vld [vmem:[#allocation2 + $0x10] sm:$0xff]  ;;  %v251_v26 = vld [vmem:[#allocation2 + $0x20] sm:$0xff]  ;;  %v252_v30 = vld [vmem:[#allocation2 + $0x28] sm:$0xff] }
  0xa0   :  { %v183_v48 = vadd.f32 %v175_v46, %v137_v45 }
  0xa1   :  { %v644_v35 = vmul.f32 -1.442695, %v181_v32  ;;  %v645_v36 = vmul.f32 -1.442695, %v182_v34  ;;  %v646_v40 = vmul.f32 -1.442695, %v184_v39 }
  0xa3   :  { %693 = vpow2.f32 %v644_v35 }
  0xa4   :  { %695 = vpow2.f32 %v645_v36 }
  0xa5   :  { %697 = vpow2.f32 %v646_v40 }
  0xa9   :  { %v694_v41 = vpop.eup %693 }
  0xaa   :  { %v696_v42 = vpop.eup %695  ;;  %v194_v43 = vadd.f32 1.0, %v694_v41 }
  0xab   :  { %v195_v44 = vadd.f32 1.0, %v696_v42  ;;  %v698_v47 = vpop.eup %697 }
  0xac   :  { %699 = vrcp.f32 %v194_v43  ;;  %v196_v49 = vadd.f32 1.0, %v698_v47  ;;  %v208_v56 = vand.u32 2147483648, %v194_v43  ;;  %v206_v59 = vand.u32 2147483647, %v194_v43 }
  0xad   :  { %701 = vrcp.f32 %v195_v44  ;;  %v223_v57 = vand.u32 2147483648, %v195_v44  ;;  %v221_v61 = vand.u32 2147483647, %v195_v44  ;;  %vm202_vm5 = vweird.f32 %v194_v43 }
  0xae   :  { %703 = vrcp.f32 %v196_v49  ;;  %vm217_vm6 = vweird.f32 %v195_v44  ;;  %v209_v1 = vor.u32 1.1754944e-38, %v208_v56  ;;  %vm207_vm8 = vcmp.eq.f32.partialorder %v206_v59, 8.507059e+37 }
  0xaf   :  { %705 = vtanh.f32 %v183_v48  ;;  %v224_v4 = vor.u32 1.1754944e-38, %v223_v57  ;;  %vm222_vm10 = vcmp.eq.f32.partialorder %v221_v61, 8.507059e+37  ;;  %v238_v19 = vand.u32 2147483648, %v196_v49 }
  0xb0   :  { %vm232_vm12 = vweird.f32 %v196_v49  ;;  %v236_v20 = vand.u32 2147483647, %v196_v49 }
  0xb1   :  { %v239_v22 = vor.u32 1.1754944e-38, %v238_v19 }
  0xb2   :  { %v700_v50 = vpop.eup %699  ;;  %vm237_vm14 = vcmp.eq.f32.partialorder %v236_v20, 8.507059e+37  ;;  %v361_v20 = vld [vmem:[%s1020_s6 + $0x10] sm:$0xff] }
  0xb3   :  { %v702_v51 = vpop.eup %701  ;;  %v198_v52 = vmul.f32 %v700_v50, %v194_v43  ;;  %vm203_vm3 = vweird.f32 %v700_v50  ;;  %v253_v43 = vld [vmem:[#allocation2 + $0x30] sm:$0xff] }
  0xb4   :  { %v213_v53 = vmul.f32 %v702_v51, %v195_v44  ;;  %vm218_vm4 = vweird.f32 %v702_v51  ;;  %v704_v62 = vpop.eup %703  ;;  %vm204_vm7 = vmor %vm202_vm5, %vm203_vm3  ;;  %vm377_vm3 = vcmask 1043456  }
  0xb5   :  { %v199_v54 = vsub.f32 1.0, %v198_v52  ;;  %v706_v0 = vpop.eup %705  ;;  %v228_v3 = vmul.f32 %v704_v62, %v196_v49  ;;  %vm219_vm9 = vmor %vm217_vm6, %vm218_vm4  ;;  %vm233_vm11 = vweird.f32 %v704_v62 }
  0xb6   :  { %v214_v55 = vsub.f32 1.0, %v213_v53  ;;  %vm234_vm13 = vmor %vm232_vm12, %vm233_vm11  ;;  %v363_v53 = vld [vmem:[%s1015_s1] sm:$0xf] }
  0xb7   :  { %v200_v58 = vmul.f32 %v700_v50, %v199_v54  ;;  %v229_v12 = vsub.f32 1.0, %v228_v3  ;;  %654 = vmatpush.msk.msrb.mxu2 %vm377_vm3, %v363_v53 }
  0xb8   :  { %v215_v60 = vmul.f32 %v702_v51, %v214_v55 }
  0xb9   :  { %v201_v63 = vadd.f32 %v700_v50, %v200_v58  ;;  %v230_v16 = vmul.f32 %v704_v62, %v229_v12  ;;  %v359_v58 = vld [vmem:[%s1020_s6] sm:$0xff] }
  0xba   :  { %v216_v2 = vadd.f32 %v702_v51, %v215_v60 }
  0xbb   :  { %v205_v9 = vsel %vm204_vm7, %v700_v50, %v201_v63  ;;  %v231_v18 = vadd.f32 %v704_v62, %v230_v16  ;;  %vm364_vm7 = vcmask 31744   ;;  %v453_v16 = vld [vmem:[%s1021_s7 + $0x8] sm:$0xff] }
  0xbc   :  { %v210_v10 = vsel %vm207_vm8, %v209_v1, %v205_v9  ;;  %v220_v11 = vsel %vm219_vm9, %v702_v51, %v216_v2  ;;  %655 = vmatmul.msk.f32.vlgmr.msrb.gmra.mxu2 %vm364_vm7, %v359_v58  ;;  %v761_v9 = vmov 0   ;;  %v489_v58 = vld [vmem:[%s1023_s9 + $0x8] sm:$0xff] }
  0xbd   :  { %v225_v13 = vsel %vm222_vm10, %v224_v4, %v220_v11  ;;  %v244_v14 = vmul.f32 %v706_v0, %v210_v10  ;;  %v235_v21 = vsel %vm234_vm13, %v704_v62, %v231_v18  ;;  %v360_v4 = vld [vmem:[%s1020_s6 + $0x8] sm:$0xff]  ;;  %690 = vset.pattern.permute.xlu0 %v761_v9  ;;  %v455_v10 = vld [vmem:[%s1021_s7 + $0x18] sm:$0xff]  ;;  %691 = vset.pattern.permute.xlu1 %v761_v9 }
  0xbe   :  { %v243_v15 = vmul.f32 0.0, %v225_v13  ;;  %v240_v24 = vsel %vm237_vm14, %v239_v22, %v235_v21  ;;  %473 = vperm.xlu0 %690, %v455_v10   ;;  %692 = vset.pattern.permute.xlu2 %v761_v9  ;;  %v454_v21 = vld [vmem:[%s1021_s7 + $0x10] sm:$0xff] }
  0xbf   :  { %463 = vperm.xlu1 %691, %v453_v16  }
  0xc0   :  { %v904_v17 = vadd.f32 %v244_v14, %v243_v15 }
  0xc2   :  { %707 = vtanh.f32 %v904_v17 }
  0xc4   :  { %656 = vmatmul.msk.f32.gmra.mxu2 %vm364_vm7, %v360_v4  ;;  %v487_v4 = vld [vmem:[%s1022_s8 + $0x18] sm:$0xff] }
  0xc6   :  { %468 = vperm.xlu0 %690, %v454_v21  }
  0xc8   :  { %v708_v23 = vpop.eup %707 }
  0xc9   :  { %v247_v25 = vmul.f32 %v708_v23, %v240_v24 }
  0xcb   :  { %249 = vst.msk [vmem:[#allocation3] sm:$0xff] %vm130_vm1, %v247_v25  ;;  %270 = vmatpush.msrb.mxu1 %v247_v25 }
  0xcc   :  { %647 = vmatmul.msk.f32.vlgmr.msrb.gmra.mxu1 %vm139_vm2, %v846_v5  ;;  %657 = vmatmul.msk.f32.gmra.mxu2 %vm364_vm7, %v361_v20 }
  0xd4   :  { %648 = vmatmul.msk.f32.gmra.mxu1 %vm139_vm2, %v851_v6 }
  0xdc   :  { %649 = vmatmul.msk.f32.gmra.mxu1 %vm139_vm2, %v856_v7 }
  0xe4   :  { %650 = vmatmul.msk.f32.gmra.mxu1 %vm139_vm2, %v861_v8  ;;  %v254_v8 = vld [vmem:[#allocation2 + $0x38] sm:$0xff] }
 0x149   :  { %v272_v27 = vpop.f32.mrf.mxu1 }
 0x14a   :  { %v284_v28 = vadd.f32 %v272_v27, %v251_v26 }
 0x14c   :  { %v651_v29 = vmul.f32 -1.442695, %v284_v28  ;;  %v452_v28 = vld [vmem:[%s1021_s7] sm:$0xff] }
 0x14d   :  { %458 = vperm.xlu1 %691, %v452_v28  }
 0x14e   :  { %709 = vpow2.f32 %v651_v29  ;;  %v362_v29 = vld [vmem:[%s1020_s6 + $0x18] sm:$0xff] }
 0x14f   :  { %658 = vmatmul.msk.f32.gmra.mxu2 %vm364_vm7, %v362_v29 }
 0x151   :  { %v275_v31 = vpop.f32.mrf.mxu1 }
 0x152   :  { %v285_v32 = vadd.f32 %v275_v31, %v252_v30  ;;  %v490_v30 = vld [vmem:[%s1023_s9 + $0x10] sm:$0xff]  ;;  %v491_v31 = vld [vmem:[%s1023_s9 + $0x18] sm:$0xff] }
 0x153   :  { %504 = vperm.xlu0 %690, %v490_v30  }
 0x154   :  { %v710_v33 = vpop.eup %709  ;;  %v652_v34 = vmul.f32 -1.442695, %v285_v32  ;;  %v559_v32 = vld [vmem:[%s1024_s10 + $0x8] sm:$0xff] }
 0x155   :  { %v297_v5 = vadd.f32 1.0, %v710_v33  ;;  %509 = vperm.xlu1 %691, %v491_v31  }
 0x156   :  { %711 = vpow2.f32 %v652_v34  ;;  %v355_v34 = vld [vmem:[%s1019_s5] sm:$0xff] }
 0x157   :  { %713 = vrcp.f32 %v297_v5  ;;  %v311_v50 = vand.u32 2147483648, %v297_v5  ;;  %vm305_vm4 = vweird.f32 %v297_v5  ;;  %v309_v54 = vand.u32 2147483647, %v297_v5 }
 0x159   :  { %v278_v6 = vpop.f32.mrf.mxu1  ;;  %v312_v62 = vor.u32 1.1754944e-38, %v311_v50  ;;  %vm310_vm10 = vcmp.eq.f32.partialorder %v309_v54, 8.507059e+37 }
 0x15a   :  { %v286_v47 = vadd.f32 %v278_v6, %v253_v43  ;;  %v560_v6 = vld [vmem:[%s1024_s10 + $0x10] sm:$0xff] }
 0x15b   :  { %569 = vperm.xlu0 %690, %v559_v32  }
 0x15c   :  { %v712_v35 = vpop.eup %711 }
 0x15d   :  { %v714_v36 = vpop.eup %713  ;;  %v298_v7 = vadd.f32 1.0, %v712_v35  ;;  %v599_v35 = vld [vmem:[#allocation4] sm:$0x1]  ;;  %574 = vperm.xlu1 %691, %v560_v6  }
 0x15e   :  { %v301_v37 = vmul.f32 %v714_v36, %v297_v5  ;;  %vm306_vm15 = vweird.f32 %v714_v36  ;;  %v353_v5 = vld [vmem:[#allocation3] sm:$0xff] }
 0x15f   :  { %715 = vrcp.f32 %v298_v7  ;;  %v326_v48 = vand.u32 2147483648, %v298_v7  ;;  %v324_v52 = vand.u32 2147483647, %v298_v7  ;;  %vm320_vm5 = vweird.f32 %v298_v7  ;;  %vm919_vm6 = vmor %vm305_vm4, %vm306_vm15 }
 0x160   :  { %v302_v38 = vsub.f32 1.0, %v301_v37  ;;  %v358_v37 = vld [vmem:[%s1019_s5 + $0x18] sm:$0xff]  ;;  %vm607_vm15 = vcmask 8192  }
 0x161   :  { %v281_v39 = vpop.f32.mrf.mxu1  ;;  %v327_v59 = vor.u32 1.1754944e-38, %v326_v48  ;;  %vm325_vm9 = vcmp.eq.f32.partialorder %v324_v52, 8.507059e+37 }
 0x162   :  { %v287_v40 = vadd.f32 %v281_v39, %v254_v8  ;;  %v303_v44 = vmul.f32 %v714_v36, %v302_v38  ;;  %v398_v8 = vpop.f32.mrf.mxu2 }
 0x163   :  { %602 = vperm.xlu0 %690, %v599_v35  }
 0x164   :  { %v653_v41 = vmul.f32 -1.442695, %v287_v40  ;;  %v304_v49 = vadd.f32 %v714_v36, %v303_v44  ;;  %v464_v44 = vpop.permute.xlu1 %463 }
 0x165   :  { %v716_v42 = vpop.eup %715 }
 0x166   :  { %v316_v45 = vmul.f32 %v716_v42, %v298_v7  ;;  %717 = vpow2.f32 %v653_v41  ;;  %vm321_vm2 = vweird.f32 %v716_v42  ;;  %v308_v60 = vsel %vm919_vm6, %v714_v36, %v304_v49  ;;  %v356_v36 = vld [vmem:[%s1019_s5 + $0x8] sm:$0xff]  ;;  %v357_v7 = vld [vmem:[%s1019_s5 + $0x10] sm:$0xff] }
 0x167   :  { %719 = vtanh.f32 %v286_v47  ;;  %vm322_vm8 = vmor %vm320_vm5, %vm321_vm2  ;;  %v313_v1 = vsel %vm310_vm10, %v312_v62, %v308_v60 }
 0x168   :  { %v317_v46 = vsub.f32 1.0, %v316_v45  ;;  %v488_v45 = vld [vmem:[%s1023_s9] sm:$0xff] }
 0x169   :  { %494 = vperm.xlu2 %692, %v488_v45  }
 0x16a   :  { %v318_v51 = vmul.f32 %v716_v42, %v317_v46  ;;  %v401_v39 = vpop.f32.mrf.mxu2 }
 0x16c   :  { %v718_v55 = vpop.eup %717  ;;  %v319_v57 = vadd.f32 %v716_v42, %v318_v51 }
 0x16d   :  { %v299_v61 = vadd.f32 1.0, %v718_v55  ;;  %v720_v3 = vpop.eup %719 }
 0x16e   :  { %v323_v63 = vsel %vm322_vm8, %v716_v42, %v319_v57  ;;  %v347_v11 = vmul.f32 %v720_v3, %v313_v1  ;;  %v474_v42 = vpop.permute.xlu0 %473  ;;  %v485_v1 = vld [vmem:[%s1022_s8 + $0x8] sm:$0xff]  ;;  %v486_v3 = vld [vmem:[%s1022_s8 + $0x10] sm:$0xff] }
 0x16f   :  { %v328_v0 = vsel %vm325_vm9, %v327_v59, %v323_v63  ;;  %721 = vrcp.f32 %v299_v61  ;;  %v339_v19 = vand.u32 2147483647, %v299_v61  ;;  %vm335_vm12 = vweird.f32 %v299_v61  ;;  %v484_v63 = vld [vmem:[%s1022_s8] sm:$0xff]  ;;  %s762_s8 = smov [#allocation5]  }
 0x170   :  { %v346_v2 = vmul.f32 %v328_v0, %v904_v17  ;;  %v341_v17 = vand.u32 2147483648, %v299_v61  ;;  %v558_v0 = vld [vmem:[%s1024_s10] sm:$0xff] }
 0x171   :  { %vm340_vm14 = vcmp.eq.f32.partialorder %v339_v19, 8.507059e+37  ;;  %499 = vperm.xlu2 %692, %v489_v58  }
 0x172   :  { %v348_v13 = vadd.f32 %v347_v11, %v346_v2  ;;  %v342_v23 = vor.u32 1.1754944e-38, %v341_v17  ;;  %v404_v41 = vpop.f32.mrf.mxu2  ;;  %v561_v2 = vld [vmem:[%s1024_s10 + $0x18] sm:$0xff]  ;;  %s614_s10 = sshll.u32 %s762_s8, 4  ;;  %s615_s10 = int_to_ptr.vmem [resolvable:$true] %s614_s10 }
 0x174   :  { %723 = vtanh.f32 %v348_v13 }
 0x175   :  { %v722_v12 = vpop.eup %721 }
 0x176   :  { %v331_v14 = vmul.f32 %v722_v12, %v299_v61  ;;  %vm336_vm11 = vweird.f32 %v722_v12  ;;  %v469_v51 = vpop.permute.xlu0 %468 }
 0x177   :  { %vm337_vm13 = vmor %vm335_vm12, %vm336_vm11 }
 0x178   :  { %v332_v15 = vsub.f32 1.0, %v331_v14 }
 0x179   :  { %564 = vperm.xlu2 %692, %v558_v0  }
 0x17a   :  { %v333_v18 = vmul.f32 %v722_v12, %v332_v15  ;;  %v724_v25 = vpop.eup %723 }
 0x17c   :  { %v334_v22 = vadd.f32 %v722_v12, %v333_v18 }
 0x17e   :  { %v338_v24 = vsel %vm337_vm13, %v722_v12, %v334_v22 }
 0x17f   :  { %v343_v26 = vsel %vm340_vm14, %v342_v23, %v338_v24 }
 0x180   :  { %v350_v27 = vmul.f32 %v724_v25, %v343_v26 }
 0x181   :  { %579 = vperm.xlu2 %692, %v561_v2  }
 0x182   :  { %352 = vst.msk [vmem:[#allocation3 + $0x8] sm:$0xff] %vm130_vm1, %v350_v27 }
 0x189   :  { %v354_v33 = vld [vmem:[#allocation3 + $0x8] sm:$0xff] }
 0x18a   :  { %437 = vmatpush.msrb.mxu3 %v354_v33 }
 0x18c   :  { %438 = vmatpush.msrb.mxu3 %v353_v5 }
 0x18d   :  { %659 = vmatmul.msk.f32.vlgmr.msrb.gmra.mxu3 %vm86_vm0, %v355_v34 }
 0x195   :  { %660 = vmatmul.msk.f32.gmra.mxu3 %vm86_vm0, %v356_v36 }
 0x19d   :  { %661 = vmatmul.msk.f32.gmra.mxu3 %vm86_vm0, %v357_v7 }
 0x1a5   :  { %662 = vmatmul.msk.f32.gmra.mxu3 %vm86_vm0, %v358_v37  ;;  %vm512_vm0 = vcmask 261120  }
 0x1bf   :  { %v459_v55 = vpop.permute.xlu1 %458 }
 0x1c3   :  { %v495_v9 = vpop.permute.xlu2 %494 }
 0x1c5   :  { %v505_v13 = vpop.permute.xlu0 %504 }
 0x1c7   :  { %v510_v14 = vpop.permute.xlu1 %509 }
 0x1cb   :  { %v500_v11 = vpop.permute.xlu2 %499 }
 0x1cd   :  { %v570_v23 = vpop.permute.xlu0 %569 }
 0x1cf   :  { %v575_v25 = vpop.permute.xlu1 %574 }
 0x1d2   :  { %v407_v46 = vpop.f32.mrf.mxu2 }
 0x1d3   :  { %v565_v20 = vpop.permute.xlu2 %564 }
 0x1db   :  { %v580_v5 = vpop.permute.xlu2 %579 }
 0x210   :  { %v440_v38 = vpop.f32.mrf.mxu3 }
 0x211   :  { %v441_v52 = vadd.f32 %v440_v38, %v398_v8 }
 0x213   :  { %v476_v59 = vadd.f32 %v459_v55, %v441_v52 }
 0x215   :  { %v480_v62 = vmax.f32 %v476_v59, 0.0 }
 0x218   :  { %v443_v40 = vpop.f32.mrf.mxu3 }
 0x219   :  { %v444_v49 = vadd.f32 %v443_v40, %v401_v39  ;;  %v603_v40 = vpop.permute.xlu0 %602 }
 0x21b   :  { %v477_v57 = vadd.f32 %v464_v44, %v444_v49 }
 0x21d   :  { %v481_v61 = vmax.f32 %v477_v57, 0.0 }
 0x220   :  { %v446_v43 = vpop.f32.mrf.mxu3 }
 0x221   :  { %v447_v47 = vadd.f32 %v446_v43, %v404_v41 }
 0x223   :  { %v478_v54 = vadd.f32 %v469_v51, %v447_v47 }
 0x225   :  { %v482_v60 = vmax.f32 %v478_v54, 0.0 }
 0x228   :  { %v449_v48 = vpop.f32.mrf.mxu3 }
 0x229   :  { %v450_v50 = vadd.f32 %v449_v48, %v407_v46 }
 0x22b   :  { %v479_v53 = vadd.f32 %v474_v42, %v450_v50  ;;  %v605_v42 = vperm.slane %v603_v40, 0 }
 0x22d   :  { %v483_v56 = vmax.f32 %v479_v53, 0.0 }
 0x22f   :  { %537 = vmatpush.msrb.mxu0 %v483_v56 }
 0x231   :  { %538 = vmatpush.msrb.mxu0 %v482_v60 }
 0x233   :  { %539 = vmatpush.msrb.mxu0 %v481_v61 }
 0x235   :  { %540 = vmatpush.msrb.mxu0 %v480_v62 }
 0x236   :  { %663 = vmatmul.msk.f32.vlgmr.msrb.gmra.mxu0 %vm512_vm0, %v484_v63 }
 0x23e   :  { %664 = vmatmul.msk.f32.gmra.mxu0 %vm512_vm0, %v485_v1 }
 0x246   :  { %665 = vmatmul.msk.f32.gmra.mxu0 %vm512_vm0, %v486_v3 }
 0x24e   :  { %666 = vmatmul.msk.f32.gmra.mxu0 %vm512_vm0, %v487_v4 }
 0x2b3   :  { %v542_v10 = vpop.f32.mrf.mxu0 }
 0x2b4   :  { %v543_v16 = vadd.f32 %v542_v10, %v495_v9 }
 0x2b6   :  { %v554_v21 = vmax.f32 %v543_v16, 0.0 }
 0x2b8   :  { %v582_v26 = vmul.f32 %v565_v20, %v554_v21 }
 0x2ba   :  { %v586_v31 = vsel %vm130_vm1, %v582_v26, 0.0 }
 0x2bb   :  { %v545_v12 = vpop.f32.mrf.mxu0 }
 0x2bc   :  { %v546_v15 = vadd.f32 %v545_v12, %v500_v11 }
 0x2be   :  { %v555_v18 = vmax.f32 %v546_v15, 0.0 }
 0x2c0   :  { %v583_v24 = vmul.f32 %v570_v23, %v555_v18 }
 0x2c2   :  { %v587_v29 = vsel %vm130_vm1, %v583_v24, 0.0 }
 0x2c3   :  { %v548_v17 = vpop.f32.mrf.mxu0  ;;  %v588_v34 = vadd.f32 %v587_v29, %v586_v31 }
 0x2c4   :  { %v549_v19 = vadd.f32 %v548_v17, %v505_v13 }
 0x2c6   :  { %v556_v22 = vmax.f32 %v549_v19, 0.0 }
 0x2c8   :  { %v584_v27 = vmul.f32 %v575_v25, %v556_v22 }
 0x2ca   :  { %v589_v32 = vsel %vm130_vm1, %v584_v27, 0.0 }
 0x2cb   :  { %v551_v28 = vpop.f32.mrf.mxu0  ;;  %v590_v35 = vadd.f32 %v589_v32, %v588_v34 }
 0x2cc   :  { %v552_v30 = vadd.f32 %v551_v28, %v510_v14 }
 0x2ce   :  { %v557_v33 = vmax.f32 %v552_v30, 0.0 }
 0x2d0   :  { %v585_v6 = vmul.f32 %v580_v5, %v557_v33 }
 0x2d2   :  { %v591_v36 = vsel %vm130_vm1, %v585_v6, 0.0 }
 0x2d3   :  { %v592_v7 = vadd.f32 %v591_v36, %v590_v35 }
 0x2d5   :  { %v593_v37 = vrot.slane %v592_v7, 4 }
 0x2d7   :  { %v594_v8 = vadd.f32 %v593_v37, %v592_v7 }
 0x2d9   :  { %v595_v38 = vrot.slane %v594_v8, 2 }
 0x2db   :  { %v596_v39 = vadd.f32 %v595_v38, %v594_v8 }
 0x2dd   :  { %v597_v41 = vrot.slane %v596_v39, 1 }
 0x2df   :  { %v598_v43 = vadd.f32 %v597_v41, %v596_v39 }
 0x2e1   :  { %v606_v44 = vadd.f32 %v605_v42, %v598_v43 }
 0x2e3   :  { %608 = vst.msk [vmem:[#allocation5] sm:$0x1] %vm607_vm15, %v606_v44 }
 0x2e4   :  { %619 = dma.vmem_to_hbm [thread:$0]  %s615_s10, 16, %s617_s13, [#allocation6]  }
 0x2e5   :  { %753 = dma.done.wait [#allocation6], 16  }
 0x2e6   :  { %754 = vsyncadd [#allocation6], 4294967280 }
 0x2e7   :  { %624 = vsyncpa [#allocation6], 1 }

</bundles_post_ra>
